<compile_context>
chip_gen: v7x
topology: tpu7x:2x2x1
jax: 0.10.0
libtpu: 0.0.40
codegen_flags: <defaults>
</compile_context>

<pallas_src>
import functools

import jax
import jax.numpy as jnp
from jax.experimental import pallas as pl
from jax.experimental.pallas import tpu as pltpu


def _round_up(v, m):
    return ((v + m - 1) // m) * m


def _sublane_tile(dtype):
    """Native sublane packing for a dtype: f32 -> 8, bf16 -> 16, int8 -> 32."""
    itemsize = jnp.dtype(dtype).itemsize
    return 8 * max(1, 4 // itemsize)


def _vmem_budget_and_limit():
    """Generation-gated VMEM sizing.

    v5e/v6e have 128 MiB physical VMEM -> spend more per tile (fewer grid
    steps / tiny output DMAs).  v7x has 64 MiB physical / 32 MiB default scope,
    so keep the conservative sizing there (and for unknown devices).
    """
    kind = ""
    try:
        kind = jax.devices()[0].device_kind.lower()
    except Exception:
        pass
    if ("v5" in kind) or ("v6" in kind):
        return 48 * 1024 * 1024, 64 * 1024 * 1024
    return 24 * 1024 * 1024, 32 * 1024 * 1024


def _bytes_per_lane(b, s, w_dtype, x_dtype, z1_dtype, z2_dtype):
    """Per-lane VMEM cost: double-buffered input tiles (dtype & sublane-packing
    aware) plus the in-kernel f32 working set (casts + elementwise temps)."""
    in_bytes = (
        b * _round_up(s, _sublane_tile(w_dtype)) * jnp.dtype(w_dtype).itemsize
        + _round_up(b, _sublane_tile(x_dtype)) * jnp.dtype(x_dtype).itemsize
        + _round_up(b, _sublane_tile(z1_dtype)) * jnp.dtype(z1_dtype).itemsize
        + _round_up(b, _sublane_tile(z2_dtype)) * jnp.dtype(z2_dtype).itemsize
    )
    tmp_bytes = 4 * (b * _round_up(s, 8) + 6 * _round_up(b, 8))
    return 2 * in_bytes + tmp_bytes


def _choose_tiling(n, bytes_per_lane, budget_bytes, max_chunks_per_block=128):
    """Pick (TN, num_blocks, padded_N).

    Goals: TN fits the double-buffered VMEM budget; num_blocks >= 4 (when N
    allows) so input DMA / compute / writeback overlap; num_blocks even when
    possible so v7x megacore sharding is balanced; leftover lanes zero-padded.
    """
    n_chunks = -(-n // 128)                                   # 128-lane chunks
    budget_chunks = max(1, int(budget_bytes) // (int(bytes_per_lane) * 128))
    budget_chunks = min(budget_chunks, max_chunks_per_block)
    min_blocks = min(4, n_chunks)
    cpb = max(1, min(budget_chunks, n_chunks // min_blocks))
    blocks = -(-n_chunks // cpb)
    if blocks > 1 and blocks % 2 == 1:
        # Prefer an even block count (v7x: 2 TensorCores). Shrinking the tile
        # never adds padding beyond the last partial block.
        for c in range(cpb, 0, -1):
            b = -(-n_chunks // c)
            if b % 2 == 0:
                cpb, blocks = c, b
                break
    tn = cpb * 128
    return tn, blocks, blocks * tn


def _mc_encoder_loss_kernel(w_ref, x_ref, z1_ref, z2_ref, out_ref, *,
                            inv_s, lane_chunks):
    """One grid step == one lane tile of the flattened (C*D) axis.

    w_ref  : (B, S, TN)   spiketrain tile (any dtype; cast to f32 in-kernel)
    x_ref  : (B, TN)      input tile
    z1_ref : (B, TN)      layer-1 tile
    z2_ref : (B, TN)      layer-2 tile
    out_ref: (1, 1, 128)  lane-wise partial sums for this block
    """
    # Explicit f32 casts right after load: v5e has no bf16 VPU/EUP path, and
    # this is what makes a narrow-dtype (bf16/int8) W cheap on the HBM side.
    w = w_ref[...].astype(jnp.float32)
    x = x_ref[...].astype(jnp.float32)
    z1 = z1_ref[...].astype(jnp.float32)
    z2 = z2_ref[...].astype(jnp.float32)

    # Spike-rate decode: mean over the spike axis (sublane reduce).
    xhat = jnp.sum(w, axis=1) * jnp.float32(inv_s)            # (B, TN)

    d0 = xhat - x
    d1 = z1 - x
    d2 = z2 - z1
    sq = d0 * d0 + d1 * d1 + d2 * d2                          # (B, TN)

    # Lane-wise accumulation: fold TN lanes onto 128 accumulators with static
    # 128-aligned slices + VPU adds (no cross-lane tree reduce in the hot
    # path, lane-dense unmasked output store, better f32 accuracy).
    acc = sq[:, 0:128]
    for j in range(1, lane_chunks):
        acc = acc + sq[:, j * 128:(j + 1) * 128]
    partial = jnp.sum(acc, axis=0, keepdims=True)             # (1, 128)
    out_ref[...] = partial.reshape(1, 1, 128)


def multi_channel_encoder_loss(preds, X):
    """Pallas equivalent of MultiChannelEncoderLoss.forward.

    preds = (W, Z1, Z2)
      W  : (B, S, C*D)  spiketrain (f32 / bf16 / int8 — narrow dtypes cut HBM traffic)
      Z1 : (B, C, D)
      Z2 : (B, C, D)
    X    : (B, C, H, Wd) or (B, C, D)
    Returns a float32 scalar.
    """
    W, Z1, Z2 = preds
    if X.ndim == 4:
        X = X.reshape(X.shape[0], X.shape[1], -1)             # flatten(start_dim=-2)
    B, C, D = X.shape
    _, S, N = W.shape
    assert N == C * D, (N, C, D)

    # Free, contiguous reshapes only (no transposes, no extra HBM traffic).
    Xf = X.reshape(B, N)
    Z1f = Z1.reshape(B, N)
    Z2f = Z2.reshape(B, N)

    budget, vmem_limit = _vmem_budget_and_limit()
    bpl = _bytes_per_lane(B, S, W.dtype, Xf.dtype, Z1f.dtype, Z2f.dtype)
    TN, num_blocks, n_pad = _choose_tiling(N, bpl, budget)

    # Zero-pad the lane axis to num_blocks*TN. Exact: padded elements give
    # xhat = x = z1 = z2 = 0, contributing 0 to every squared term; the final
    # scale uses the true element count B*C*D.
    pad = n_pad - N
    if pad:
        W = jnp.pad(W, ((0, 0), (0, 0), (0, pad)))
        Xf = jnp.pad(Xf, ((0, 0), (0, pad)))
        Z1f = jnp.pad(Z1f, ((0, 0), (0, pad)))
        Z2f = jnp.pad(Z2f, ((0, 0), (0, pad)))

    kernel = functools.partial(_mc_encoder_loss_kernel,
                               inv_s=1.0 / S, lane_chunks=TN // 128)

    # Advisory: tell XLA this custom call is memory-bound and how big it is.
    cost = pl.CostEstimate(
        flops=int(B * S * n_pad + 8 * B * n_pad),
        transcendentals=0,
        bytes_accessed=int(W.size * W.dtype.itemsize
                           + Xf.size * Xf.dtype.itemsize
                           + Z1f.size * Z1f.dtype.itemsize
                           + Z2f.size * Z2f.dtype.itemsize
                           + num_blocks * 128 * 4),
    )

    partials = pl.pallas_call(
        kernel,
        out_shape=jax.ShapeDtypeStruct((num_blocks, 1, 128), jnp.float32),
        grid_spec=pltpu.PrefetchScalarGridSpec(
            num_scalar_prefetch=0,
            grid=(num_blocks,),
            in_specs=[
                pl.BlockSpec((B, S, TN), lambda i: (0, 0, i)),
                pl.BlockSpec((B, TN), lambda i: (0, i)),
                pl.BlockSpec((B, TN), lambda i: (0, i)),
                pl.BlockSpec((B, TN), lambda i: (0, i)),
            ],
            out_specs=pl.BlockSpec((1, 1, 128), lambda i: (i, 0, 0)),
        ),
        compiler_params=pltpu.CompilerParams(
            dimension_semantics=("parallel",),
            vmem_limit_bytes=vmem_limit,
        ),
        cost_estimate=cost,
    )(W, Xf, Z1f, Z2f)

    # mean over channels of per-channel means == global mean (equal counts),
    # so one combined 1/(B*C*D) factor is exact.
    return jnp.sum(partials) / jnp.float32(B * C * D)


def _reference_loss(preds, X):
    """Pure-JAX reference matching the assumed EncoderLoss semantics (per-channel loop)."""
    W, Z1, Z2 = preds
    if X.ndim == 4:
        X = X.reshape(X.shape[0], X.shape[1], -1)
    B, C, D = X.shape
    _, S, _ = W.shape
    Wr = W.astype(jnp.float32).reshape(B, S, C, D)
    losses = []
    for c in range(C):
        xc = X[:, c]
        wc = Wr[:, :, c]
        z1c = Z1[:, c]
        z2c = Z2[:, c]
        xhat = jnp.mean(wc, axis=1)
        loss = (
            jnp.mean((xhat - xc) ** 2)
            + jnp.mean((z1c - xc) ** 2)
            + jnp.mean((z2c - z1c) ** 2)
        )
        losses.append(loss)
    return jnp.mean(jnp.stack(losses))


if __name__ == "__main__":
    # Small, forward-consistent shapes:
    #   batch=2, channels=4, spatial 16x16 -> D=256, n_spikes_per_timestep=4
    B, C, H, Wd, S = 2, 4, 16, 16, 4
    D = H * Wd

    key = jax.random.PRNGKey(0)
    k1, k2, k3, k4 = jax.random.split(key, 4)
    X = jax.random.normal(k1, (B, C, H, Wd), dtype=jnp.float32)
    # Spiketrains are binary, so store W narrow (bf16 here; int8 also supported
    # by the dtype-aware budget) — W dominates HBM traffic, so this is the
    # single biggest bandwidth lever. Values {0,1} are exact in bf16.
    W = jax.random.bernoulli(k2, 0.3, (B, S, C * D)).astype(jnp.bfloat16)
    Z1 = jax.random.normal(k3, (B, C, D), dtype=jnp.float32)
    Z2 = jax.random.normal(k4, (B, C, D), dtype=jnp.float32)

    loss = jax.block_until_ready(multi_channel_encoder_loss((W, Z1, Z2), X))
    ref = jax.block_until_ready(_reference_loss((W, Z1, Z2), X))
    assert jnp.allclose(loss, ref, rtol=1e-5, atol=1e-5), (loss, ref)

    print("KERNEL_OK")
</pallas_src>

<mosaic_0001>
module attributes {stable_mosaic.version = 11 : i64} {
  func.func @_mc_encoder_loss_kernel(%arg0: i32, %arg1: memref<2x4x256xbf16, #tpu.memory_space<vmem>>, %arg2: memref<2x256xf32, #tpu.memory_space<vmem>>, %arg3: memref<2x256xf32, #tpu.memory_space<vmem>>, %arg4: memref<2x256xf32, #tpu.memory_space<vmem>>, %arg5: memref<1x1x128xf32, #tpu.memory_space<vmem>>) attributes {dimension_semantics = [#tpu.dimension_semantics<parallel>], iteration_bounds = array<i64: 4>, scalar_prefetch = 0 : i64, scratch_operands = 0 : i64, tpu.core_type = #tpu.core_type<tc>, window_params = [{transform_indices = @transform_0, window_bounds = array<i64: 2, 4, 256>}, {transform_indices = @transform_1, window_bounds = array<i64: 2, 256>}, {transform_indices = @transform_2, window_bounds = array<i64: 2, 256>}, {transform_indices = @transform_3, window_bounds = array<i64: 2, 256>}, {transform_indices = @transform_4, window_bounds = array<i64: 1, 1, 128>}]} {
    %c0 = arith.constant 0 : index
    %c0_0 = arith.constant 0 : index
    %c0_1 = arith.constant 0 : index
    %0 = vector.load %arg1[%c0, %c0_0, %c0_1] : memref<2x4x256xbf16, #tpu.memory_space<vmem>>, vector<2x4x256xbf16>
    %1 = arith.extf %0 : vector<2x4x256xbf16> to vector<2x4x256xf32>
    %c0_2 = arith.constant 0 : index
    %c0_3 = arith.constant 0 : index
    %2 = vector.load %arg2[%c0_2, %c0_3] : memref<2x256xf32, #tpu.memory_space<vmem>>, vector<2x256xf32>
    %c0_4 = arith.constant 0 : index
    %c0_5 = arith.constant 0 : index
    %3 = vector.load %arg3[%c0_4, %c0_5] : memref<2x256xf32, #tpu.memory_space<vmem>>, vector<2x256xf32>
    %c0_6 = arith.constant 0 : index
    %c0_7 = arith.constant 0 : index
    %4 = vector.load %arg4[%c0_6, %c0_7] : memref<2x256xf32, #tpu.memory_space<vmem>>, vector<2x256xf32>
    %cst = arith.constant dense<0.000000e+00> : vector<2x256xf32>
    %5 = vector.multi_reduction <add>, %1, %cst [1] : vector<2x4x256xf32> to vector<2x256xf32>
    %cst_8 = arith.constant 2.500000e-01 : f32
    %6 = vector.broadcast %cst_8 : f32 to vector<2x256xf32>
    %7 = arith.mulf %5, %6 : vector<2x256xf32>
    %8 = arith.subf %7, %2 : vector<2x256xf32>
    %9 = arith.subf %3, %2 : vector<2x256xf32>
    %10 = arith.subf %4, %3 : vector<2x256xf32>
    %11 = arith.mulf %8, %8 : vector<2x256xf32>
    %12 = arith.mulf %9, %9 : vector<2x256xf32>
    %13 = arith.addf %11, %12 : vector<2x256xf32>
    %14 = arith.mulf %10, %10 : vector<2x256xf32>
    %15 = arith.addf %13, %14 : vector<2x256xf32>
    %16 = vector.extract_strided_slice %15 {offsets = [0, 0], sizes = [2, 128], strides = [1, 1]} : vector<2x256xf32> to vector<2x128xf32>
    %17 = vector.extract_strided_slice %15 {offsets = [0, 128], sizes = [2, 128], strides = [1, 1]} : vector<2x256xf32> to vector<2x128xf32>
    %18 = arith.addf %16, %17 : vector<2x128xf32>
    %cst_9 = arith.constant dense<0.000000e+00> : vector<128xf32>
    %19 = vector.multi_reduction <add>, %18, %cst_9 [0] : vector<2x128xf32> to vector<128xf32>
    %20 = vector.shape_cast %19 : vector<128xf32> to vector<1x128xf32>
    %21 = vector.shape_cast %20 : vector<1x128xf32> to vector<1x1x128xf32>
    %c0_10 = arith.constant 0 : index
    %c0_11 = arith.constant 0 : index
    %c0_12 = arith.constant 0 : index
    %22 = vector.load %arg5[%c0_10, %c0_11, %c0_12] : memref<1x1x128xf32, #tpu.memory_space<vmem>>, vector<1x1x128xf32>
    tpu.vector_store %arg5[%c0_10, %c0_11, %c0_12], %21 {strides = array<i32>} : memref<1x1x128xf32, #tpu.memory_space<vmem>>, vector<1x1x128xf32>,
    return
  }
  func.func @transform_0(%arg0: i32) -> (i32, i32, i32) {
    %c0_i32 = arith.constant 0 : i32
    %c0_i32_0 = arith.constant 0 : i32
    %c0_i32_1 = arith.constant 0 : i32
    return %c0_i32, %c0_i32_0, %arg0 : i32, i32, i32
  }
  func.func @transform_1(%arg0: i32) -> (i32, i32) {
    %c0_i32 = arith.constant 0 : i32
    %c0_i32_0 = arith.constant 0 : i32
    return %c0_i32, %arg0 : i32, i32
  }
  func.func @transform_2(%arg0: i32) -> (i32, i32) {
    %c0_i32 = arith.constant 0 : i32
    %c0_i32_0 = arith.constant 0 : i32
    return %c0_i32, %arg0 : i32, i32
  }
  func.func @transform_3(%arg0: i32) -> (i32, i32) {
    %c0_i32 = arith.constant 0 : i32
    %c0_i32_0 = arith.constant 0 : i32
    return %c0_i32, %arg0 : i32, i32
  }
  func.func @transform_4(%arg0: i32) -> (i32, i32, i32) {
    %c0_i32 = arith.constant 0 : i32
    %c0_i32_0 = arith.constant 0 : i32
    %c0_i32_1 = arith.constant 0 : i32
    return %arg0, %c0_i32, %c0_i32_0 : i32, i32, i32
  }
}

</mosaic_0001>

<bundles_post_ra>
// kernel: tpu_custom_call.1
= control target key start
LH: loop header
LB: loop body
LE: loop exit
PB: predicated region body
PF: predicated region fallthrough
CT: control target
= control target key end

     0   :  { %s1198_s0 = inlined_call_operand.hbm [shape: bf16[2,4,1024], index: 0, kind: input, shape index: {}]   ;;  %s1199_s1 = inlined_call_operand.hbm [shape: f32[2,1024], index: 1, kind: input, shape index: {}]   ;;  %s1200_s2 = inlined_call_operand.hbm [shape: f32[2,1024], index: 2, kind: input, shape index: {}]   ;;  %s1201_s3 = inlined_call_operand.hbm [shape: f32[2,1024], index: 3, kind: input, shape index: {}]   ;;  %s1202_s4 = inlined_call_operand.hbm [shape: f32[4,1,128], index: 4, kind: output, shape index: {}]  }
   0x1   :  { %1210 = sst [smem:[#allocation18_spill]] %s1198_s0 }
   0x2   :  { %1211 = sst [smem:[#allocation19_spill]] %s1199_s1 }
   0x3   :  { %9 = vsyncpa [#allocation3], 0 }
   0x4   :  { %11 = vsyncpa [#allocation3 + $0x1], 0 }
   0x5   :  { %12 = vsyncpa [#allocation6], 0 }
   0x6   :  { %14 = vsyncpa [#allocation6 + $0x1], 0 }
   0x7   :  { %15 = vsyncpa [#allocation9], 0 }
   0x8   :  { %17 = vsyncpa [#allocation9 + $0x1], 0 }
   0x9   :  { %18 = vsyncpa [#allocation4], 0 }
   0xa   :  { %20 = vsyncpa [#allocation4 + $0x1], 0  ;;  %s929_s15 = smov 0   ;;  %s931_s16 = smov 0  }
   0xb   :  { %s933_s17 = smov 0   ;;  %s935_s18 = smov 0  }
   0xc LB: > { %1212 = sst [smem:[#allocation15_spill]] %s889_s17  ;;  %s950_s19 = sadd.s32 4294967295, %s893_s18   ;;  %s893_s18 = sphi %s935_s18, %s1231_s18   ;;  %s889_s17 = sphi %s933_s17, %s1233_s17   ;;  %s885_s16 = sphi %s931_s16, %s1235_s16   ;;  %s881_s15 = sphi %s929_s15, %s1234_s15  }
   0xd   : > { %s603_s20 = sadd.s32 4294967294, %s893_s18   ;;  %s954_s21 = sadd.s32 1, %s893_s18  }
   0xe   : > { %1213 = sst [smem:[#allocation16_spill]] %s954_s21  ;;  %s33_s22 = sadd.s32 1, %s889_s17 }
   0xf   : > { %s30_s23 = ssub.s32 %s893_s18, %s954_s21  ;;  %p40_p0 = scmp.ne.s32.totalorder %s889_s17, %s885_s16 }
  0x10   : > { %p31_p1 = scmp.eq.s32.totalorder %s30_s23, 0  ;;  %p41_p2 = scmp.eq.s32.totalorder %s893_s18, 0 }
  0x11   : > { %p46_p3 = scmp.ne.s32.totalorder %s885_s16, %s881_s15  ;;  %p47_p4 = scmp.eq.s32.totalorder %s950_s19, 0 }
  0x12   : > { %s966_s24 = scalar_select %p31_p1, %s889_s17, %s33_s22  }
  0x13   : > { %p42_p5 = por %p41_p2, %p40_p0  ;;  %p968_p6 = por %p47_p4, %p46_p3 }
  0x14   : > { %1214 = sst [smem:[#allocation17_spill]] %s966_s24  ;;  %p148_p7 = scmp.eq.s32.totalorder %s950_s19, 3 }
  0x15   : > { %s1215_s25 = scalar_select %p968_p6, 1, 0 }
  0x16   : > { %p154_p8 = scmp.eq.s32.totalorder %s603_s20, 3  ;;  %p661_p9 = scmp.lt.s32.totalorder %s893_s18, 4 }
  0x17   : > { %p974_p10 = por %p148_p7, %p40_p0  ;;  %s983_s28 = sand.u32 1, %s889_s17  }
  0x18   : > { %p978_p11 = por %p154_p8, %p46_p3  ;;  %s986_s29 = sshll.u32 %s893_s18, 6 }
  0x19   : > { %s1216_s26 = scalar_select %p974_p10, 1, 0 }
  0x1a   : > { %s1217_s27 = scalar_select %p978_p11, 1, 0 }
  0x1b   : > { %s1218_s0 = sld [smem:[#allocation18_spill]]  ;;  %p994_p12 = pnand %p661_p9, %p42_p5 }
  0x1c   : > { %s195_s8 = sand.u32 1, %s893_s18   ;;  %s1000_s9 = sshll.u32 %s983_s28, 2 }
  0x1d   : > { %s1219_s7 = scalar_select %p994_p12, 1, 0 }
  0x1e   : > { %s1220_s1 = sld [smem:[#allocation19_spill]]  ;;  %s199_s13 = scalar_lea.vmem [#allocation5], %s1000_s9 }
  0x1f   : > { %s207_s14 = sshll.u32 %s199_s13, 4  ;;  %s1013_s20 = scalar_lea.sflag [#allocation6], %s195_s8  ;;  %s1010_s14 = int_to_ptr.vmem [resolvable:$true] %s207_s14 }
  0x20   : > { %p1019_p2 = pneg %p994_p12 }
  0x21   : > { %s992_s6 = scalar_lea.hbm %s1218_s0, %s986_s29 }
  0x24   : > { %s1006_s12 = scalar_lea.hbm %s1220_s1, %s986_s29  ;;  %s704_s10 = scalar_lea.hbm %s1220_s1, 256 }
  0x25   : > { %s699_s22 = scalar_lea.hbm %s1006_s12, 64  ;;  %p705_p5 = scmp.lt.u32.totalorder %s1006_s12, %s1220_s1 }
  0x26   : > { %p700_p1 = scmp.ne.s32.totalorder %s1006_s12, %s699_s22  ;;  %p706_p7 = scmp.lt.u32.totalorder %s704_s10, %s699_s22 }
  0x27   : > { %p708_p9 = scmp.lt.u32.totalorder %s699_s22, %s1006_s12 }
  0x28   : > { %p702_p3 = pnand %p1019_p2, %p700_p1  ;;  %p707_p8 = por %p706_p7, %p705_p5 }
  0x2a   : > { %p703_p4 = pneg %p702_p3  ;;  %p709_p13 = por %p708_p9, %p707_p8 }
  0x2c   : > { %p710_p0 = pnand %p709_p13, %p703_p4 }
  0x2e   : > { %713 = shalt.err (!%p710_p0)
}
  0x2f   : > { %s714_s8 = scalar_lea.vmem %s1010_s14, 64  ;;  %s895_s30 = smov [#allocation5]  }
  0x30   : > { %p715_p1 = scmp.ne.s32.totalorder %s1010_s14, %s714_s8  ;;  %s719_s5 = sshll.u32 %s895_s30, 4  ;;  %s720_s5 = int_to_ptr.vmem [resolvable:$false] %s719_s5 }
  0x31   : > { %s721_s11 = scalar_lea.vmem %s720_s5, 128  ;;  %p722_p10 = scmp.lt.s32.totalorder %s1010_s14, %s720_s5 }
  0x32   : > { %p717_p3 = pnand %p715_p1, %p1019_p2  ;;  %p723_p6 = scmp.lt.s32.totalorder %s721_s11, %s714_s8 }
  0x34   : > { %p718_p11 = pneg %p717_p3  ;;  %p724_p5 = por %p723_p6, %p722_p10 }
  0x36   : > { %p725_p7 = pnand %p724_p5, %p718_p11 }
  0x38   : > { %728 = shalt.err (!%p725_p7)
}
  0x39   : > { %650 = dma.hbm_to_vmem [thread:$0]  (!%p994_p12), %s1006_s12, 64, %s1010_s14, %s1013_s20  }
  0x3a   : > { %p1222_p13 = scmp.lt.s32.totalorder %s893_s18, 5  ;;  %p1223_p0 = scmp.ge.s32.totalorder %s893_s18, 1 }
  0x3b   : > { %s606_s10 = sshll.u32 %s983_s28, 3  ;;  %s175_s30 = scalar_lea.sflag [#allocation3], %s983_s28 }
  0x3c   : > { %p1047_p6 = pnand %p1223_p0, %p1222_p13  ;;  %s178_s13 = scalar_lea.vmem [#allocation2], %s606_s10 }
  0x3d   : > { %s185_s8 = sshll.u32 %s178_s13, 4  ;;  %s729_s5 = scalar_lea.hbm %s992_s6, 128  ;;  %s1052_s8 = int_to_ptr.vmem [resolvable:$true] %s185_s8 }
  0x3e   : > { %s1224_s22 = scalar_select %p1047_p6, 1, 0 }
  0x3f   : > { %p730_p10 = scmp.ne.s32.totalorder %s992_s6, %s729_s5  ;;  %s734_s12 = scalar_lea.hbm %s1218_s0, 512 }
  0x40   : > { %p735_p8 = scmp.lt.u32.totalorder %s992_s6, %s1218_s0  ;;  %p736_p9 = scmp.lt.u32.totalorder %s734_s12, %s729_s5 }
  0x41   : > { %p732_p11 = pnand %p730_p10, %p1019_p2  ;;  %p738_p3 = scmp.lt.u32.totalorder %s729_s5, %s992_s6 }
  0x42   : > { %p737_p1 = por %p736_p9, %p735_p8 }
  0x43   : > { %p733_p4 = pneg %p732_p11 }
  0x44   : > { %p739_p5 = por %p738_p3, %p737_p1 }
  0x46   : > { %p740_p7 = pnand %p739_p5, %p733_p4 }
  0x48   : > { %743 = shalt.err (!%p740_p7)
}
  0x49   : > { %s744_s10 = scalar_lea.vmem %s1052_s8, 128  ;;  %s896_s1 = smov [#allocation2]  }
  0x4a   : > { %p745_p13 = scmp.ne.s32.totalorder %s1052_s8, %s744_s10  ;;  %s749_s13 = sshll.u32 %s896_s1, 4  ;;  %s750_s13 = int_to_ptr.vmem [resolvable:$false] %s749_s13 }
  0x4b   : > { %s751_s24 = scalar_lea.vmem %s750_s13, 256  ;;  %p752_p11 = scmp.lt.s32.totalorder %s1052_s8, %s750_s13 }
  0x4c   : > { %p747_p0 = pnand %p745_p13, %p1019_p2  ;;  %p753_p6 = scmp.lt.s32.totalorder %s751_s24, %s744_s10 }
  0x4e   : > { %p748_p10 = pneg %p747_p0  ;;  %p754_p8 = por %p753_p6, %p752_p11 }
  0x50   : > { %p755_p9 = pnand %p754_p8, %p748_p10 }
  0x52   : > { %758 = shalt.err (!%p755_p9)
}
  0x53   : > { %s897_s5 = smov 256   ;;  %s898_s11 = smov 64  }
  0x54   : > { %s899_s12 = smov 4   ;;  %s1082_s10 = scalar_lea.hbm %s1200_s2, %s986_s29 }
  0x55   : > { %647 = dma.hbm_to_vmem [thread:$0]  (!%p994_p12), %s992_s6, 128, %s1052_s8, %s175_s30, %s897_s5, %s898_s11, %s899_s12  }
  0x56   : > { %s218_s13 = scalar_lea.vmem [#allocation7], %s1000_s9  ;;  %s759_s0 = scalar_lea.hbm %s1082_s10, 64 }
  0x57   : > { %s226_s24 = sshll.u32 %s218_s13, 4  ;;  %p760_p6 = scmp.ne.s32.totalorder %s1082_s10, %s759_s0  ;;  %s227_s24 = int_to_ptr.vmem [resolvable:$true] %s226_s24 }
  0x58   : > { %s764_s6 = scalar_lea.hbm %s1200_s2, 256  ;;  %p765_p3 = scmp.lt.u32.totalorder %s1082_s10, %s1200_s2 }
  0x59   : > { %p762_p4 = pnand %p760_p6, %p1019_p2  ;;  %p766_p5 = scmp.lt.u32.totalorder %s764_s6, %s759_s0 }
  0x5a   : > { %p768_p13 = scmp.lt.u32.totalorder %s759_s0, %s1082_s10 }
  0x5b   : > { %p763_p1 = pneg %p762_p4  ;;  %p767_p7 = por %p766_p5, %p765_p3 }
  0x5d   : > { %p769_p0 = por %p768_p13, %p767_p7 }
  0x5f   : > { %p770_p10 = pnand %p769_p0, %p763_p1 }
  0x61   : > { %773 = shalt.err (!%p770_p10)
}
  0x62   : > { %s774_s5 = scalar_lea.vmem %s227_s24, 64  ;;  %s900_s11 = smov [#allocation7]  }
  0x63   : > { %p775_p11 = scmp.ne.s32.totalorder %s227_s24, %s774_s5  ;;  %s779_s12 = sshll.u32 %s900_s11, 4  ;;  %s780_s12 = int_to_ptr.vmem [resolvable:$false] %s779_s12 }
  0x64   : > { %s781_s17 = scalar_lea.vmem %s780_s12, 128  ;;  %p782_p6 = scmp.lt.s32.totalorder %s227_s24, %s780_s12 }
  0x65   : > { %p777_p8 = pnand %p775_p11, %p1019_p2  ;;  %p783_p4 = scmp.lt.s32.totalorder %s781_s17, %s774_s5 }
  0x67   : > { %p778_p9 = pneg %p777_p8  ;;  %p784_p12 = por %p783_p4, %p782_p6 }
  0x69   : > { %p785_p3 = pnand %p784_p12, %p778_p9 }
  0x6b   : > { %788 = shalt.err (!%p785_p3)
}
  0x6c   : > { %p1225_p5 = scmp.ne.s32.totalorder %s1219_s7, 0  ;;  %s1107_s14 = scalar_lea.hbm %s1201_s3, %s986_s29 }
  0x6d   : > { %s237_s1 = scalar_lea.vmem [#allocation8], %s1000_s9  ;;  %s234_s6 = scalar_lea.sflag [#allocation9], %s983_s28 }
  0x6e   : > { %653 = dma.hbm_to_vmem [thread:$0]  (!%p1225_p5), %s1082_s10, 64, %s227_s24, %s1013_s20  }
  0x6f   : > { %s245_s13 = sshll.u32 %s237_s1, 4  ;;  %s789_s8 = scalar_lea.hbm %s1107_s14, 64  ;;  %s246_s13 = int_to_ptr.vmem [resolvable:$true] %s245_s13 }
  0x70   : > { %p790_p12 = scmp.ne.s32.totalorder %s1107_s14, %s789_s8  ;;  %s794_s10 = scalar_lea.hbm %s1201_s3, 256 }
  0x71   : > { %p795_p13 = scmp.lt.u32.totalorder %s1107_s14, %s1201_s3  ;;  %p796_p0 = scmp.lt.u32.totalorder %s794_s10, %s789_s8 }
  0x72   : > { %p792_p1 = pnand %p790_p12, %p1019_p2  ;;  %p798_p11 = scmp.lt.u32.totalorder %s789_s8, %s1107_s14 }
  0x73   : > { %p797_p10 = por %p796_p0, %p795_p13 }
  0x74   : > { %p793_p7 = pneg %p792_p1 }
  0x75   : > { %p799_p8 = por %p798_p11, %p797_p10 }
  0x77   : > { %p800_p9 = pnand %p799_p8, %p793_p7 }
  0x79   : > { %803 = shalt.err (!%p800_p9)
}
  0x7a   : > { %s804_s28 = scalar_lea.vmem %s246_s13, 64  ;;  %s901_s9 = smov [#allocation8]  }
  0x7b   : > { %p805_p6 = scmp.ne.s32.totalorder %s246_s13, %s804_s28  ;;  %s809_s5 = sshll.u32 %s901_s9, 4  ;;  %s810_s5 = int_to_ptr.vmem [resolvable:$false] %s809_s5 }
  0x7c   : > { %s811_s11 = scalar_lea.vmem %s810_s5, 128  ;;  %p812_p12 = scmp.lt.s32.totalorder %s246_s13, %s810_s5 }
  0x7d   : > { %p807_p4 = pnand %p805_p6, %p1019_p2  ;;  %p813_p1 = scmp.lt.s32.totalorder %s811_s11, %s804_s28 }
  0x7f   : > { %p808_p3 = pneg %p807_p4  ;;  %p814_p5 = por %p813_p1, %p812_p12 }
  0x81   : > { %p815_p0 = pnand %p814_p5, %p808_p3 }
  0x83   : > { %818 = shalt.err (!%p815_p0)
}
  0x84   : > { %p1226_p13 = scmp.ne.s32.totalorder %s1219_s7, 0  ;;  %p1227_p7 = scmp.ne.s32.totalorder %s1224_s22, 0 }
  0x85   : > { %s1131_s23 = sand.u32 (!%p1227_p7), 1, %s885_s16   ;;  %p1228_p2 = scmp.ne.s32.totalorder (!%p1227_p7), %s1215_s25, 0 }
  0x86   : > { %656 = dma.hbm_to_vmem [thread:$0]  (!%p1226_p13), %s1107_s14, 64, %s246_s13, %s234_s6  }
  0x87   : > { %254 = sbr.rel (%p1227_p7) target bundleno = 209 (0xd1), region = 36  ;;  %s619_s12 = sshll.u32 (!%p1227_p7), %s1131_s23, 3 }
  0x88   : > { %s257_s17 = scalar_lea.sflag (!%p1227_p7), [#allocation3], %s1131_s23  ;;  %s260_s0 = scalar_lea.vmem (!%p1227_p7), [#allocation2], %s619_s12 }
  0x8e   : > { %864 = dma.done.wait (%p1228_p2), %s257_s17, 128  }
  0x8f   : > { %866 = vsyncadd (%p1228_p2), %s257_s17, 4294967168  ;;  %s265_s7 = sand.u32 1, %s950_s19   ;;  %s620_s22 = sshll.u32 %s1131_s23, 2 }
  0x90   : > { %s266_s21 = scalar_lea.sflag [#allocation6], %s265_s7  ;;  %s269_s14 = scalar_lea.vmem [#allocation5], %s620_s22 }
  0x91   : > { %868 = dma.done.wait (%p1228_p2), %s266_s21, 128  }
  0x92   : > { %870 = vsyncadd (%p1228_p2), %s266_s21, 4294967168  ;;  %s278_s1 = scalar_lea.vmem [#allocation7], %s620_s22  ;;  %s284_s13 = scalar_lea.sflag [#allocation9], %s1131_s23 }
  0x93   : > { %s287_s6 = scalar_lea.vmem [#allocation8], %s620_s22 }
  0x94   : > { %872 = dma.done.wait (%p1228_p2), %s284_s13, 64  }
  0x95   : > { %874 = vsyncadd (%p1228_p2), %s284_s13, 4294967232  ;;  %v902_v0 = vmov 1983009808   ;;  %v380_v2 = vlaneseq  ;;  %v631_v5 = vld [vmem:[%s260_s0] sm:$0xff]   ;;  %v334_v6 = vld [vmem:[%s269_s14] sm:$0xf] }
  0x96   : > { %v378_v1 = vunpack.c.l.s4 %v902_v0  ;;  %v335_v7 = vld [vmem:[%s278_s1] sm:$0xf]  ;;  %vm343_vm0 = vcmask 1043456   ;;  %v632_v8 = vunpack.c.l.bf16 %v631_v5  ;;  %v633_v9 = vunpack.c.h.bf16 %v631_v5  ;;  %v336_v10 = vld [vmem:[%s287_s6] sm:$0xf]  ;;  %s325_s25 = scalar_lea.vmem [#allocation10], %s1131_s23 }
  0x97   : > { %v381_v4 = vshrl.u32 %v380_v2, 7  ;;  %v395_v12 = vsub.f32 %v335_v7, %v334_v6  ;;  %v396_v21 = vsub.f32 %v336_v10, %v335_v7  ;;  %vm446_vm1 = vcmask 1041409   ;;  %s471_s8 = sshll.u32 %s325_s25, 4  ;;  %s623_s30 = sshll.u32 %s950_s19, 4  ;;  %s1152_s8 = int_to_ptr.vmem [resolvable:$true] %s471_s8 }
  0x98   : > { %v379_v3 = vunpack.c.0.s8 %v378_v1  ;;  %v339_v13 = vcombine.high %v632_v8, %v632_v8  ;;  %v340_v14 = vcombine.high %v633_v9, %v633_v9  ;;  %v344_v15 = vsel %vm343_vm0, %v632_v8, 0.0  ;;  %s1157_s24 = scalar_lea.hbm %s1202_s4, %s623_s30  ;;  %s459_s29 = scalar_lea.sflag [#allocation4], %s1131_s23 }
  0x99   : > { %v358_v16 = vsel %vm343_vm0, %v633_v9, 0.0  ;;  %v345_v17 = vrot.slane %v344_v15, 4  ;;  %v401_v27 = vmul.f32 %v395_v12, %v395_v12  ;;  %v421_v32 = vmul.f32 %v396_v21, %v396_v21  ;;  %s819_s28 = scalar_lea.vmem %s1152_s8, 16  ;;  %p1229_p10 = scmp.ne.s32.totalorder %s1216_s26, 0 }
  0x9a   : > { %v382_v11 = vsub.s32 %v379_v3, %v381_v4  ;;  %v359_v18 = vrot.slane %v358_v16, 4  ;;  %v351_v19 = vsel %vm343_vm0, %v339_v13, 0.0  ;;  %v365_v20 = vsel %vm343_vm0, %v340_v14, 0.0  ;;  %p820_p5 = scmp.ne.s32.totalorder %s1152_s8, %s819_s28  ;;  %s903_s19 = smov [#allocation10]  }
  0x9b   : > { %v346_v22 = vadd.f32 %v345_v17, %v344_v15  ;;  %v352_v23 = vrot.slane %v351_v19, 4  ;;  %v366_v25 = vrot.slane %v365_v20, 4  ;;  %vm449_vm2 = vcmask 1041408   ;;  %s823_s9 = sshll.u32 %s903_s19, 4  ;;  %s824_s9 = int_to_ptr.vmem [resolvable:$false] %s823_s9 }
  0x9c   : > { %v360_v24 = vadd.f32 %v359_v18, %v358_v16  ;;  %v383_v26 = vrot.slane %v334_v6, %v382_v11  ;;  %v409_v38 = vrot.slane %v401_v27, %v382_v11  ;;  %v429_v44 = vrot.slane %v421_v32, %v382_v11  ;;  %p821_p11 = pnand %p820_p5, %p1229_p10  ;;  %s825_s5 = scalar_lea.vmem %s824_s9, 32 }
  0x9d   : > { %v347_v28 = vrot.slane %v346_v22, 2  ;;  %v353_v29 = vadd.f32 %v352_v23, %v351_v19  ;;  %v367_v31 = vadd.f32 %v366_v25, %v365_v20  ;;  %p826_p9 = scmp.lt.s32.totalorder %s1152_s8, %s824_s9  ;;  %p827_p6 = scmp.lt.s32.totalorder %s825_s5, %s819_s28 }
  0x9e   : > { %v361_v30 = vrot.slane %v360_v24, 2  ;;  %v384_v37 = vcombine.high %v383_v26, %v383_v26  ;;  %v385_v43 = vrot.slane %v383_v26, 1  ;;  %v410_v50 = vcombine.high %v409_v38, %v409_v38  ;;  %p822_p8 = pneg %p821_p11 }
  0x9f   : > { %v348_v33 = vadd.f32 %v347_v28, %v346_v22  ;;  %v354_v34 = vrot.slane %v353_v29, 2  ;;  %v368_v36 = vrot.slane %v367_v31, 2  ;;  %v411_v55 = vrot.slane %v409_v38, 1  ;;  %p828_p4 = por %p827_p6, %p826_p9 }
  0xa0   : > { %v362_v35 = vadd.f32 %v361_v30, %v360_v24  ;;  %v386_v49 = vrot.slane %v384_v37, 1  ;;  %v430_v56 = vcombine.high %v429_v44, %v429_v44  ;;  %v412_v61 = vrot.slane %v410_v50, 1 }
  0xa1   : > { %v349_v39 = vrot.slane %v348_v33, 1  ;;  %v355_v40 = vadd.f32 %v354_v34, %v353_v29  ;;  %v369_v42 = vadd.f32 %v368_v36, %v367_v31  ;;  %v431_v62 = vrot.slane %v429_v44, 1  ;;  %p829_p3 = pnand %p828_p4, %p822_p8 }
  0xa2   : > { %v363_v41 = vrot.slane %v362_v35, 1  ;;  %v432_v3 = vrot.slane %v430_v56, 1 }
  0xa3   : > { %v350_v45 = vadd.f32 %v349_v39, %v348_v33  ;;  %v356_v46 = vrot.slane %v355_v40, 1  ;;  %v370_v48 = vrot.slane %v369_v42, 1 }
  0xa4   : > { %v364_v47 = vadd.f32 %v363_v41, %v362_v35 }
  0xa5   : > { %v357_v51 = vadd.f32 %v356_v46, %v355_v40  ;;  %v371_v52 = vadd.f32 %v370_v48, %v369_v42  ;;  %v372_v53 = vmul.f32 0.25, %v350_v45 }
  0xa6   : > { %v374_v54 = vmul.f32 0.25, %v364_v47 }
  0xa7   : > { %v373_v57 = vmul.f32 0.25, %v357_v51  ;;  %v375_v58 = vmul.f32 0.25, %v371_v52  ;;  %v391_v59 = vsub.f32 %v372_v53, %v383_v26 }
  0xa8   : > { %v393_v60 = vsub.f32 %v374_v54, %v385_v43 }
  0xa9   : > { %v392_v63 = vsub.f32 %v373_v57, %v384_v37  ;;  %v394_v0 = vsub.f32 %v375_v58, %v386_v49  ;;  %v397_v1 = vmul.f32 %v391_v59, %v391_v59 }
  0xaa   : > { %v399_v2 = vmul.f32 %v393_v60, %v393_v60 }
  0xab   : > { %v398_v4 = vmul.f32 %v392_v63, %v392_v63  ;;  %v400_v5 = vmul.f32 %v394_v0, %v394_v0  ;;  %v417_v6 = vadd.f32 %v409_v38, %v397_v1 }
  0xac   : > { %v419_v7 = vadd.f32 %v411_v55, %v399_v2 }
  0xad   : > { %v418_v8 = vadd.f32 %v410_v50, %v398_v4  ;;  %v420_v9 = vadd.f32 %v412_v61, %v400_v5  ;;  %v437_v10 = vadd.f32 %v429_v44, %v417_v6 }
  0xae   : > { %v439_v11 = vadd.f32 %v431_v62, %v419_v7 }
  0xaf   : > { %v438_v12 = vadd.f32 %v430_v56, %v418_v8  ;;  %v440_v13 = vadd.f32 %v432_v3, %v420_v9 }
  0xb1   : > { %v441_v14 = vadd.f32 %v438_v12, %v437_v10  ;;  %v442_v15 = vadd.f32 %v440_v13, %v439_v11 }
  0xb3   : > { %v445_v16 = vrot.slane %v442_v15, 7 }
  0xb5   : > { %v447_v17 = vsel %vm446_vm1, %v445_v16, %v441_v14 }
  0xb6   : > { %v450_v18 = vsel %vm449_vm2, %v447_v17, 0.0 }
  0xb7   : > { %v451_v19 = vrot.slane %v450_v18, 4 }
  0xb9   : > { %v452_v20 = vadd.f32 %v451_v19, %v450_v18 }
  0xbb   : > { %v453_v21 = vrot.slane %v452_v20, 2 }
  0xbd   : > { %v454_v22 = vadd.f32 %v453_v21, %v452_v20 }
  0xbf   : > { %v455_v23 = vrot.slane %v454_v22, 1 }
  0xc1   : > { %v456_v24 = vadd.f32 %v455_v23, %v454_v22 }
  0xc3   : > { %457 = vst [vmem:[%s325_s25] sm:$0x1] %v456_v24 }
  0xc4   : > { %832 = shalt.err (!%p829_p3)
}
  0xc5   : > { %s833_s11 = scalar_lea.hbm %s1157_s24, 16  ;;  %s837_s17 = scalar_lea.hbm %s1202_s4, 64 }
  0xc6   : > { %p834_p12 = scmp.ne.s32.totalorder %s1157_s24, %s833_s11  ;;  %p838_p13 = scmp.lt.u32.totalorder %s1157_s24, %s1202_s4 }
  0xc7   : > { %p839_p7 = scmp.lt.u32.totalorder %s837_s17, %s833_s11  ;;  %p841_p5 = scmp.lt.u32.totalorder %s833_s11, %s1157_s24 }
  0xc8   : > { %p835_p1 = pnand %p834_p12, %p1229_p10 }
  0xc9   : > { %p840_p2 = por %p839_p7, %p838_p13 }
  0xca   : > { %p836_p0 = pneg %p835_p1 }
  0xcb   : > { %p842_p11 = por %p841_p5, %p840_p2 }
  0xcd   : > { %p843_p8 = pnand %p842_p11, %p836_p0 }
  0xcf   : > { %846 = shalt.err (!%p843_p8)
}
  0xd0   : > { %642 = dma.vmem_to_hbm [thread:$0]  (%p1229_p10), %s1152_s8, 16, %s1157_s24, %s459_s29  }
  0xd1 PF: > { %p662_p9 = scmp.ge.s32.totalorder %s893_s18, 2  ;;  %s483_s22 = sand.u32 1, %s881_s15  }
  0xd2   : > { %p1230_p6 = scmp.ne.s32.totalorder %s1217_s27, 0  ;;  %s484_s21 = scalar_lea.sflag [#allocation4], %s483_s22 }
  0xd4   : > { %p658_p4 = pnand %p662_p9, %p1230_p6 }
  0xd6   : > { %876 = dma.done.wait (!%p658_p4), %s484_s21, 16  }
  0xd7   : > { %878 = vsyncadd (!%p658_p4), %s484_s21, 4294967280  ;;  %s1231_s18 = sld [smem:[#allocation16_spill]]  ;;  %s1232_s14 = sld [smem:[#allocation15_spill]] }
  0xd8   : > { %s1233_s17 = sld [smem:[#allocation17_spill]]  ;;  %s1234_s15 = smov %s885_s16 }
  0xdd   : > { %p23_p3 = scmp.ge.s32.totalorder %s1231_s18, 6   ;;  %s1235_s16 = smov %s1232_s14 }
  0xdf   :  { %25 = sbr.rel (!%p23_p3) target bundleno = 12 (0xc), region = 118 }
  0xe6   :  { %488 = vsyncpa [#allocation3], 1 }
  0xe7   :  { %490 = vsyncpa [#allocation3 + $0x1], 1 }
  0xe8   :  { %491 = vsyncpa [#allocation6], 1 }
  0xe9   :  { %493 = vsyncpa [#allocation6 + $0x1], 1 }
  0xea   :  { %494 = vsyncpa [#allocation9], 1 }
  0xeb   :  { %496 = vsyncpa [#allocation9 + $0x1], 1 }
  0xec   :  { %497 = vsyncpa [#allocation4], 1 }
  0xed   :  { %499 = vsyncpa [#allocation4 + $0x1], 1 }

</bundles_post_ra>
